<compile_context>
chip_gen: v6e
topology: v6e:2x2x1
jax: 0.10.0
libtpu: 0.0.40
codegen_flags: <defaults>
</compile_context>

<pallas_src>
import math

import jax
import jax.numpy as jnp
from jax.experimental import pallas as pl
from jax.experimental.pallas import tpu as pltpu


# ------------------------------ Pallas kernel ------------------------------

def _roi_matmul_kernel(a_ref, b_ref, o_ref, acc_ref):
    """K-tiled matmul  o = a @ b  with f32 VMEM accumulator."""
    @pl.when(pl.program_id(0) == 0)
    def _():
        acc_ref[...] = jnp.zeros_like(acc_ref)

    acc_ref[...] += jnp.dot(a_ref[...], b_ref[...],
                            preferred_element_type=jnp.float32)
    o_ref[...] = acc_ref[...].astype(o_ref.dtype)


# ----------------------- ROI-Align weight construction ----------------------

def _interp_weights(start, bin_sz, pooled, grid_dim, S):
    """Sample-averaged bilinear interpolation weights for all ROIs.

    start, bin_sz: (R,) f32.  Returns (R, pooled, grid_dim) f32 so that
    contracting the last axis against the feature grid reproduces ROI-Align's
    averaged bilinear sampling along one spatial axis.
    """
    p = jnp.arange(pooled, dtype=jnp.float32)                     # (P,)
    s = jnp.arange(S, dtype=jnp.float32)                          # (S,)
    g = jnp.arange(grid_dim, dtype=jnp.float32)                   # (G,)

    coord = (start[:, None, None]
             + p[None, :, None] * bin_sz[:, None, None]
             + (s[None, None, :] + 0.5) * bin_sz[:, None, None] / float(S))
    valid = (coord >= -1.0) & (coord <= float(grid_dim))          # (R, P, S)
    c = jnp.clip(coord, 0.0, float(grid_dim) - 1.0)
    lo = jnp.floor(c)
    frac = c - lo

    lo_e = lo[..., None]                                          # (R, P, S, 1)
    frac_e = frac[..., None]
    w = (jnp.where(g == lo_e, 1.0 - frac_e, 0.0)
         + jnp.where(g == lo_e + 1.0, frac_e, 0.0))               # (R, P, S, G)
    w = jnp.where(valid[..., None], w, 0.0)
    return jnp.sum(w, axis=2) * (1.0 / float(S))                  # (R, P, G)


def _roi_sampling_weights(rois, N, H, W, spatial_scale, pooled_h, pooled_w,
                          sample_num, roi_end_mode):
    """Per-ROI batch index + separable bilinear weight matrices WY/WX."""
    PH, PW = int(pooled_h), int(pooled_w)
    # TODO(synk): sample_num == 0 means adaptive sampling (ceil(bin) samples per
    # bin) in npu_roi_align; we require a static positive sample count.
    S = int(sample_num) if int(sample_num) > 0 else 2

    batch_idx = jnp.clip(rois[:, 0].astype(jnp.int32), 0, N - 1)  # (R,)
    x1, y1, x2, y2 = rois[:, 1], rois[:, 2], rois[:, 3], rois[:, 4]

    # TODO(synk): verify the exact roi_end_mode semantics of npu_roi_align
    # (offset before vs. after scaling / aligned -0.5 variants).
    end_off = 1.0 if int(roi_end_mode) != 0 else 0.0
    roi_start_w = x1 * float(spatial_scale)
    roi_start_h = y1 * float(spatial_scale)
    roi_end_w = (x2 + end_off) * float(spatial_scale)
    roi_end_h = (y2 + end_off) * float(spatial_scale)
    roi_w = jnp.maximum(roi_end_w - roi_start_w, 1.0)
    roi_h = jnp.maximum(roi_end_h - roi_start_h, 1.0)
    bin_w = roi_w / float(PW)
    bin_h = roi_h / float(PH)

    wy = _interp_weights(roi_start_h, bin_h, PH, H, S)            # (R, PH, H)
    wx = _interp_weights(roi_start_w, bin_w, PW, W, S)            # (R, PW, W)
    return batch_idx, wy, wx


# --------------------------------- wrapper ----------------------------------

def roi_align_pallas(features, rois, spatial_scale, pooled_h, pooled_w,
                     sample_num, roi_end_mode, *, k_tile=2048):
    """features: (N, C, H, W) f32; rois: (R, 5) = [batch_idx, x1, y1, x2, y2]."""
    N, C, H, W = features.shape
    R = rois.shape[0]
    PH, PW = int(pooled_h), int(pooled_w)

    batch_idx, wy, wx = _roi_sampling_weights(
        rois, N, H, W, spatial_scale, PH, PW, sample_num, roi_end_mode)
    onehot = (batch_idx[:, None] == jnp.arange(N)[None, :]).astype(jnp.float32)

    # Fused sampling matrix:
    #   Wt[(n,h,w),(r,p,q)] = 1[n == batch_r] * WY[r,p,h] * WX[r,q,w]
    M = R * PH * PW
    K = N * H * W
    wt = jnp.einsum('rn,rph,rqw->nhwrpq', onehot, wy, wx)
    wt = wt.reshape(K, M).astype(jnp.float32)

    # Channels-first flattened features -> matmul output lane dim is R*PH*PW.
    feat_cf = features.transpose(1, 0, 2, 3).reshape(C, K).astype(jnp.float32)

    # K-tiling (only pad when more than one K step; tiles stay 128-aligned).
    if K <= k_tile:
        tk, kp = K, K
    else:
        tk = k_tile                                   # multiple of 128
        kp = ((K + tk - 1) // tk) * tk
        feat_cf = jnp.pad(feat_cf, ((0, 0), (0, kp - K)))
        wt = jnp.pad(wt, ((0, kp - K), (0, 0)))
    num_k = kp // tk

    out_flat = pl.pallas_call(
        _roi_matmul_kernel,
        out_shape=jax.ShapeDtypeStruct((C, M), jnp.float32),
        grid_spec=pltpu.PrefetchScalarGridSpec(
            num_scalar_prefetch=0,
            grid=(num_k,),
            in_specs=[
                pl.BlockSpec((C, tk), lambda k: (0, k)),
                pl.BlockSpec((tk, M), lambda k: (k, 0)),
            ],
            out_specs=pl.BlockSpec((C, M), lambda k: (0, 0)),
            scratch_shapes=[pltpu.VMEM((C, M), jnp.float32)],
        ),
        compiler_params=pltpu.CompilerParams(
            dimension_semantics=("arbitrary",)),
    )(feat_cf, wt)

    # (C, R*PH*PW) -> (R, C, PH, PW)
    return out_flat.reshape(C, R, PH, PW).transpose(1, 0, 2, 3)


def roi_align_reference(features, rois, spatial_scale, pooled_h, pooled_w,
                        sample_num, roi_end_mode):
    """Pure-JAX reference (no Pallas) for correctness checking."""
    N, C, H, W = features.shape
    batch_idx, wy, wx = _roi_sampling_weights(
        rois, N, H, W, spatial_scale, pooled_h, pooled_w,
        sample_num, roi_end_mode)
    feat_r = features[batch_idx]                                  # (R, C, H, W)
    return jnp.einsum('rph,rchw,rqw->rcpq', wy, feat_r, wx)


# --------------------------------- module -----------------------------------

class CustomModelNpuOp:
    """JAX/Pallas equivalent of CustomModel_npu_op."""

    def __init__(self, a, b, *, key):
        # Parameter(torch.Tensor(8, 10, 1024)) + kaiming_uniform_(a=sqrt(5)):
        # fan_in = 10 * 1024, bound = 1 / sqrt(fan_in)
        fan_in = 10 * 1024
        bound = 1.0 / math.sqrt(fan_in)
        self.weight = jax.random.uniform(key, (8, 10, 1024), jnp.float32,
                                         minval=-bound, maxval=bound)

    def forward(self, a, b, d):
        spatial_scale = float(d[0])
        pooled_height = int(d[1])
        pooled_width = int(d[2])
        sample_num = int(d[3])
        roi_end_mode = int(d[4])
        # TODO(synk): torch.npu_roi_align expects rois of shape (R, 5); the
        # module passes self.weight of shape (8, 10, 1024), which is not a
        # valid rois tensor.  We interpret the first 5 values of each of the
        # 8 rows as (batch_idx, x1, y1, x2, y2) and keep the ROI-Align math.
        rois = self.weight.reshape(8, -1)[:, :5]
        return roi_align_pallas(a, rois, spatial_scale, pooled_height,
                                pooled_width, sample_num, roi_end_mode)


if __name__ == "__main__":
    key = jax.random.PRNGKey(0)
    k_w, k_a, k_b = jax.random.split(key, 3)

    # Small shapes consistent with the forward: NCHW feature map + 5 params.
    a = jax.random.normal(k_a, (2, 4, 16, 16), dtype=jnp.float32)
    b = jax.random.normal(k_b, (2, 4, 16, 16), dtype=jnp.float32)  # unused, as in the module
    d = [0.25, 4, 4, 2, 1]  # spatial_scale, pooled_h, pooled_w, sample_num, roi_end_mode

    model = CustomModelNpuOp(a, b, key=k_w)
    out = model.forward(a, b, d)
    out = jax.block_until_ready(out)

    assert out.shape == (8, 4, 4, 4), out.shape
    assert bool(jnp.all(jnp.isfinite(out)))

    # Correctness check against a pure-JAX ROI-Align reference.
    rois = model.weight.reshape(8, -1)[:, :5]
    ref = roi_align_reference(a, rois, d[0], d[1], d[2], d[3], d[4])
    assert bool(jnp.allclose(out, ref, rtol=1e-5, atol=1e-5)), \
        float(jnp.max(jnp.abs(out - ref)))

    print("KERNEL_OK")
</pallas_src>

<mosaic_0001>
module attributes {stable_mosaic.version = 11 : i64} {
  func.func @_roi_matmul_kernel(%arg0: i32, %arg1: memref<4x512xf32, #tpu.memory_space<vmem>>, %arg2: memref<512x128xf32, #tpu.memory_space<vmem>>, %arg3: memref<4x128xf32, #tpu.memory_space<vmem>>, %arg4: memref<4x128xf32, #tpu.memory_space<vmem>>) attributes {dimension_semantics = [#tpu.dimension_semantics<arbitrary>], iteration_bounds = array<i64: 1>, scalar_prefetch = 0 : i64, scratch_operands = 1 : i64, tpu.core_type = #tpu.core_type<tc>, window_params = [{transform_indices = @transform_0, window_bounds = array<i64: 4, 512>}, {transform_indices = @transform_1, window_bounds = array<i64: 512, 128>}, {pipeline_mode = #tpu.pipeline_mode<synchronous>, transform_indices = @transform_2, window_bounds = array<i64: 4, 128>}]} {
    %c0_i32 = arith.constant 0 : i32
    %0 = arith.cmpi eq, %arg0, %c0_i32 : i32
    %1 = arith.extui %0 : i1 to i32
    %c0_i32_0 = arith.constant 0 : i32
    %2 = arith.cmpi ne, %1, %c0_i32_0 : i32
    scf.if %2 {
      %cst_12 = arith.constant 0.000000e+00 : f32
      %11 = vector.broadcast %cst_12 : f32 to vector<4x128xf32>
      %c0_13 = arith.constant 0 : index
      %c0_14 = arith.constant 0 : index
      %12 = vector.load %arg4[%c0_13, %c0_14] : memref<4x128xf32, #tpu.memory_space<vmem>>, vector<4x128xf32>
      tpu.vector_store %arg4[%c0_13, %c0_14], %11 {strides = array<i32>} : memref<4x128xf32, #tpu.memory_space<vmem>>, vector<4x128xf32>,
    } else {
    }
    %c0 = arith.constant 0 : index
    %c0_1 = arith.constant 0 : index
    %3 = vector.load %arg4[%c0, %c0_1] : memref<4x128xf32, #tpu.memory_space<vmem>>, vector<4x128xf32>
    %c0_2 = arith.constant 0 : index
    %c0_3 = arith.constant 0 : index
    %4 = vector.load %arg1[%c0_2, %c0_3] : memref<4x512xf32, #tpu.memory_space<vmem>>, vector<4x512xf32>
    %c0_4 = arith.constant 0 : index
    %c0_5 = arith.constant 0 : index
    %5 = vector.load %arg2[%c0_4, %c0_5] : memref<512x128xf32, #tpu.memory_space<vmem>>, vector<512x128xf32>
    %cst = arith.constant dense<0.000000e+00> : vector<4x128xf32>
    %6 = tpu.matmul %4, %5, %cst {dimension_numbers = #tpu.dot_dimension_numbers<[1], [0], [0], [1], [0, 0, 1, 1], [], []>} : vector<4x512xf32>, vector<512x128xf32>, vector<4x128xf32> -> vector<4x128xf32>
    %7 = arith.addf %3, %6 : vector<4x128xf32>
    %c0_6 = arith.constant 0 : index
    %c0_7 = arith.constant 0 : index
    %8 = vector.load %arg4[%c0_6, %c0_7] : memref<4x128xf32, #tpu.memory_space<vmem>>, vector<4x128xf32>
    tpu.vector_store %arg4[%c0_6, %c0_7], %7 {strides = array<i32>} : memref<4x128xf32, #tpu.memory_space<vmem>>, vector<4x128xf32>,
    %c0_8 = arith.constant 0 : index
    %c0_9 = arith.constant 0 : index
    %9 = vector.load %arg4[%c0_8, %c0_9] : memref<4x128xf32, #tpu.memory_space<vmem>>, vector<4x128xf32>
    %c0_10 = arith.constant 0 : index
    %c0_11 = arith.constant 0 : index
    %10 = vector.load %arg3[%c0_10, %c0_11] : memref<4x128xf32, #tpu.memory_space<vmem>>, vector<4x128xf32>
    tpu.vector_store %arg3[%c0_10, %c0_11], %9 {strides = array<i32>} : memref<4x128xf32, #tpu.memory_space<vmem>>, vector<4x128xf32>,
    return
  }
  func.func @transform_0(%arg0: i32) -> (i32, i32) {
    %c0_i32 = arith.constant 0 : i32
    %c0_i32_0 = arith.constant 0 : i32
    return %c0_i32, %arg0 : i32, i32
  }
  func.func @transform_1(%arg0: i32) -> (i32, i32) {
    %c0_i32 = arith.constant 0 : i32
    %c0_i32_0 = arith.constant 0 : i32
    return %arg0, %c0_i32 : i32, i32
  }
  func.func @transform_2(%arg0: i32) -> (i32, i32) {
    %c0_i32 = arith.constant 0 : i32
    %c0_i32_0 = arith.constant 0 : i32
    %c0_i32_1 = arith.constant 0 : i32
    return %c0_i32, %c0_i32_0 : i32, i32
  }
}

</mosaic_0001>

<bundles_post_ra>
// kernel: tpu_custom_call.1
= control target key start
LH: loop header
LB: loop body
LE: loop exit
PB: predicated region body
PF: predicated region fallthrough
CT: control target
= control target key end

     0   :  { %7 = vsyncpa [#allocation4], 0  ;;  %s450_s0 = inlined_call_operand.hbm [shape: f32[4,512], index: 0, kind: input, shape index: {}]   ;;  %s451_s1 = inlined_call_operand.hbm [shape: f32[512,128], index: 1, kind: input, shape index: {}]   ;;  %s452_s2 = inlined_call_operand.hbm [shape: f32[4,128], index: 2, kind: output, shape index: {}]  }
   0x1   :  { %8 = vsyncpa [#allocation7], 0 }
   0x2   :  { %9 = vsyncpa [#allocation5], 0  ;;  %s420_s9 = smov [#allocation3]   ;;  %s421_s11 = smov [#allocation6]  }
   0x3   :  { %s16_s10 = sshll.u32 %s420_s9, 4  ;;  %s25_s12 = sshll.u32 %s421_s11, 4  ;;  %s17_s10 = int_to_ptr.vmem [resolvable:$true] %s16_s10  ;;  %s26_s12 = int_to_ptr.vmem [resolvable:$true] %s25_s12 }
   0x4   :  { %s362_s13 = scalar_lea.vmem %s17_s10, 256  ;;  %p367_p1 = scmp.lt.s32.totalorder %s17_s10, %s17_s10 }
   0x5   :  { %p363_p0 = scmp.ne.s32.totalorder %s17_s10, %s362_s13  ;;  %p368_p2 = scmp.lt.s32.totalorder %s362_s13, %s362_s13 }
   0x7   :  { %p369_p3 = por %p368_p2, %p367_p1 }
   0x9   :  { %p370_p4 = pnand %p369_p3, %p363_p0 }
   0xb   :  { %373 = shalt.err (!%p370_p4)
}
   0xc   :  { %19 = dma.hbm_to_vmem [thread:$0]  %s450_s0, 256, %s17_s10, [#allocation4]  }
   0xd   :  { %s382_s16 = scalar_lea.vmem %s26_s12, 8192  ;;  %p387_p6 = scmp.lt.s32.totalorder %s26_s12, %s26_s12 }
   0xe   :  { %p383_p5 = scmp.ne.s32.totalorder %s26_s12, %s382_s16  ;;  %p388_p7 = scmp.lt.s32.totalorder %s382_s16, %s382_s16 }
  0x10   :  { %p389_p8 = por %p388_p7, %p387_p6 }
  0x12   :  { %p390_p9 = pnand %p389_p8, %p383_p5 }
  0x14   :  { %393 = shalt.err (!%p390_p9)
}
  0x15   :  { %s422_s17 = smov 128   ;;  %s423_s18 = smov 8  }
  0x16   :  { %31 = dma.hbm_to_vmem [thread:$0]  %s451_s1, 8192, %s26_s12, [#allocation7], %s422_s17, %s422_s17, %s423_s18  }
  0x17   :  { %414 = dma.done.wait [#allocation4], 256  }
  0x18   :  { %415 = vsyncadd [#allocation4], 4294967040 }
  0x19   :  { %416 = dma.done.wait [#allocation7], 8192  }
  0x1a   :  { %417 = vsyncadd [#allocation7], 4294959104  ;;  %v77_v0 = vld [vmem:[#allocation6 + $0xf8] sm:$0xff]  ;;  %v76_v4 = vld [vmem:[#allocation6 + $0xf0] sm:$0xff]  ;;  %s425_s0 = smov [#allocation8]  }
  0x1b   :  { %v109_v1 = vld [vmem:[#allocation6 + $0x1f8] sm:$0xff]  ;;  %276 = vmatprep.subr.mxu0 %v77_v0  ;;  %v108_v5 = vld [vmem:[#allocation6 + $0x1f0] sm:$0xff]  ;;  %v75_v8 = vld [vmem:[#allocation6 + $0xe8] sm:$0xff]  ;;  %s266_s1 = sshll.u32 %s425_s0, 4  ;;  %s267_s1 = int_to_ptr.vmem [resolvable:$true] %s266_s1 }
  0x1c   :  { %v61_v2 = vld [vmem:[#allocation6 + $0x78] sm:$0xff]  ;;  %311 = vmatprep.subr.mxu1 %v109_v1  ;;  %v60_v6 = vld [vmem:[#allocation6 + $0x70] sm:$0xff]  ;;  %v107_v9 = vld [vmem:[#allocation6 + $0x1e8] sm:$0xff]  ;;  %s394_s21 = scalar_lea.vmem %s267_s1, 64  ;;  %p399_p11 = scmp.lt.s32.totalorder %s267_s1, %s267_s1 }
  0x1d   :  { %v93_v3 = vld [vmem:[#allocation6 + $0x178] sm:$0xff]  ;;  %277 = vmatpush3.msra.mxu0 %v61_v2  ;;  %v92_v7 = vld [vmem:[#allocation6 + $0x170] sm:$0xff]  ;;  %v59_v10 = vld [vmem:[#allocation6 + $0x68] sm:$0xff]  ;;  %p395_p10 = scmp.ne.s32.totalorder %s267_s1, %s394_s21  ;;  %p400_p12 = scmp.lt.s32.totalorder %s394_s21, %s394_s21 }
  0x1e   :  { %312 = vmatpush3.msra.mxu1 %v93_v3  ;;  %278 = vmatprep.subr.mxu0 %v76_v4  ;;  %v91_v11 = vld [vmem:[#allocation6 + $0x168] sm:$0xff]  ;;  %v74_v12 = vld [vmem:[#allocation6 + $0xe0] sm:$0xff]  ;;  %v73_v16 = vld [vmem:[#allocation6 + $0xd8] sm:$0xff]  ;;  %v424_v4 = vmov 0.0  }
  0x1f   :  { %313 = vmatprep.subr.mxu1 %v108_v5  ;;  %279 = vmatpush3.msra.mxu0 %v60_v6  ;;  %v106_v13 = vld [vmem:[#allocation6 + $0x1e0] sm:$0xff]  ;;  %v105_v17 = vld [vmem:[#allocation6 + $0x1d8] sm:$0xff]  ;;  %v72_v20 = vld [vmem:[#allocation6 + $0xd0] sm:$0xff]  ;;  %42 = vst [vmem:[#allocation2] sm:$0xf] %v424_v4  ;;  %p401_p13 = por %p400_p12, %p399_p11 }
  0x20   :  { %314 = vmatpush3.msra.mxu1 %v92_v7  ;;  %280 = vmatprep.subr.mxu0 %v75_v8  ;;  %v58_v14 = vld [vmem:[#allocation6 + $0x60] sm:$0xff]  ;;  %v57_v18 = vld [vmem:[#allocation6 + $0x58] sm:$0xff]  ;;  %v104_v21 = vld [vmem:[#allocation6 + $0x1d0] sm:$0xff] }
  0x21   :  { %315 = vmatprep.subr.mxu1 %v107_v9  ;;  %v90_v15 = vld [vmem:[#allocation6 + $0x160] sm:$0xff]  ;;  %281 = vmatpush3.msra.mxu0 %v59_v10  ;;  %v89_v19 = vld [vmem:[#allocation6 + $0x158] sm:$0xff]  ;;  %v56_v22 = vld [vmem:[#allocation6 + $0x50] sm:$0xff]  ;;  %p402_p0 = pnand %p401_p13, %p395_p10 }
  0x22   :  { %316 = vmatpush3.msra.mxu1 %v91_v11  ;;  %282 = vmatprep.subr.mxu0 %v74_v12  ;;  %v88_v23 = vld [vmem:[#allocation6 + $0x150] sm:$0xff]  ;;  %v71_v24 = vld [vmem:[#allocation6 + $0xc8] sm:$0xff]  ;;  %v70_v28 = vld [vmem:[#allocation6 + $0xc0] sm:$0xff] }
  0x23   :  { %317 = vmatprep.subr.mxu1 %v106_v13  ;;  %283 = vmatpush3.msra.mxu0 %v58_v14  ;;  %v103_v25 = vld [vmem:[#allocation6 + $0x1c8] sm:$0xff]  ;;  %v102_v29 = vld [vmem:[#allocation6 + $0x1c0] sm:$0xff]  ;;  %v69_v32 = vld [vmem:[#allocation6 + $0xb8] sm:$0xff] }
  0x24   :  { %318 = vmatpush3.msra.mxu1 %v90_v15  ;;  %284 = vmatprep.subr.mxu0 %v73_v16  ;;  %v55_v26 = vld [vmem:[#allocation6 + $0x48] sm:$0xff]  ;;  %v54_v30 = vld [vmem:[#allocation6 + $0x40] sm:$0xff]  ;;  %v101_v33 = vld [vmem:[#allocation6 + $0x1b8] sm:$0xff] }
  0x25   :  { %319 = vmatprep.subr.mxu1 %v105_v17  ;;  %285 = vmatpush3.msra.mxu0 %v57_v18  ;;  %v87_v27 = vld [vmem:[#allocation6 + $0x148] sm:$0xff]  ;;  %v86_v31 = vld [vmem:[#allocation6 + $0x140] sm:$0xff]  ;;  %v53_v34 = vld [vmem:[#allocation6 + $0x38] sm:$0xff] }
  0x26   :  { %320 = vmatpush3.msra.mxu1 %v89_v19  ;;  %286 = vmatprep.subr.mxu0 %v72_v20  ;;  %v85_v35 = vld [vmem:[#allocation6 + $0x138] sm:$0xff]  ;;  %v68_v36 = vld [vmem:[#allocation6 + $0xb0] sm:$0xff]  ;;  %v67_v40 = vld [vmem:[#allocation6 + $0xa8] sm:$0xff] }
  0x27   :  { %321 = vmatprep.subr.mxu1 %v104_v21  ;;  %287 = vmatpush3.msra.mxu0 %v56_v22  ;;  %v100_v37 = vld [vmem:[#allocation6 + $0x1b0] sm:$0xff]  ;;  %v99_v41 = vld [vmem:[#allocation6 + $0x1a8] sm:$0xff]  ;;  %v66_v44 = vld [vmem:[#allocation6 + $0xa0] sm:$0xff] }
  0x28   :  { %322 = vmatpush3.msra.mxu1 %v88_v23  ;;  %288 = vmatprep.subr.mxu0 %v71_v24  ;;  %v52_v38 = vld [vmem:[#allocation6 + $0x30] sm:$0xff]  ;;  %v51_v42 = vld [vmem:[#allocation6 + $0x28] sm:$0xff]  ;;  %v98_v45 = vld [vmem:[#allocation6 + $0x1a0] sm:$0xff] }
  0x29   :  { %323 = vmatprep.subr.mxu1 %v103_v25  ;;  %289 = vmatpush3.msra.mxu0 %v55_v26  ;;  %v84_v39 = vld [vmem:[#allocation6 + $0x130] sm:$0xff]  ;;  %v83_v43 = vld [vmem:[#allocation6 + $0x128] sm:$0xff]  ;;  %v50_v46 = vld [vmem:[#allocation6 + $0x20] sm:$0xff] }
  0x2a   :  { %324 = vmatpush3.msra.mxu1 %v87_v27  ;;  %290 = vmatprep.subr.mxu0 %v70_v28  ;;  %v82_v47 = vld [vmem:[#allocation6 + $0x120] sm:$0xff]  ;;  %v65_v48 = vld [vmem:[#allocation6 + $0x98] sm:$0xff]  ;;  %v64_v52 = vld [vmem:[#allocation6 + $0x90] sm:$0xff] }
  0x2b   :  { %325 = vmatprep.subr.mxu1 %v102_v29  ;;  %291 = vmatpush3.msra.mxu0 %v54_v30  ;;  %v97_v49 = vld [vmem:[#allocation6 + $0x198] sm:$0xff]  ;;  %v96_v53 = vld [vmem:[#allocation6 + $0x190] sm:$0xff]  ;;  %v63_v57 = vld [vmem:[#allocation6 + $0x88] sm:$0xff] }
  0x2c   :  { %326 = vmatpush3.msra.mxu1 %v86_v31  ;;  %292 = vmatprep.subr.mxu0 %v69_v32  ;;  %v49_v50 = vld [vmem:[#allocation6 + $0x18] sm:$0xff]  ;;  %v48_v54 = vld [vmem:[#allocation6 + $0x10] sm:$0xff]  ;;  %v95_v58 = vld [vmem:[#allocation6 + $0x188] sm:$0xff] }
  0x2d   :  { %327 = vmatprep.subr.mxu1 %v101_v33  ;;  %293 = vmatpush3.msra.mxu0 %v53_v34  ;;  %v81_v51 = vld [vmem:[#allocation6 + $0x118] sm:$0xff]  ;;  %v80_v55 = vld [vmem:[#allocation6 + $0x110] sm:$0xff]  ;;  %v47_v60 = vld [vmem:[#allocation6 + $0x8] sm:$0xff] }
  0x2e   :  { %328 = vmatpush3.msra.mxu1 %v85_v35  ;;  %294 = vmatprep.subr.mxu0 %v68_v36  ;;  %v44_v56 = vld [vmem:[#allocation3] sm:$0xff]  ;;  %v45_v59 = vld [vmem:[#allocation3 + $0x8] sm:$0xff]  ;;  %v79_v61 = vld [vmem:[#allocation6 + $0x108] sm:$0xff] }
  0x2f   :  { %329 = vmatprep.subr.mxu1 %v100_v37  ;;  %295 = vmatpush3.msra.mxu0 %v52_v38  ;;  %v62_v62 = vld [vmem:[#allocation6 + $0x80] sm:$0xff]  ;;  %v112_v0 = vcombine.high %v44_v56, %v44_v56  ;;  %v113_v2 = vcombine.high %v45_v59, %v45_v59  ;;  %v43_v11 = vld [vmem:[#allocation2] sm:$0xf] }
  0x30   :  { %330 = vmatpush3.msra.mxu1 %v84_v39  ;;  %296 = vmatprep.subr.mxu0 %v67_v40  ;;  %v94_v63 = vld [vmem:[#allocation6 + $0x180] sm:$0xff] }
  0x31   :  { %331 = vmatprep.subr.mxu1 %v99_v41  ;;  %297 = vmatpush3.msra.mxu0 %v51_v42  ;;  %v46_v1 = vld [vmem:[#allocation6] sm:$0xff] }
  0x32   :  { %332 = vmatpush3.msra.mxu1 %v83_v43  ;;  %298 = vmatprep.subr.mxu0 %v66_v44  ;;  %v78_v3 = vld [vmem:[#allocation6 + $0x100] sm:$0xff] }
  0x33   :  { %333 = vmatprep.subr.mxu1 %v98_v45  ;;  %299 = vmatpush3.msra.mxu0 %v50_v46 }
  0x34   :  { %334 = vmatpush3.msra.mxu1 %v82_v47  ;;  %300 = vmatprep.subr.mxu0 %v65_v48 }
  0x35   :  { %335 = vmatprep.subr.mxu1 %v97_v49  ;;  %301 = vmatpush3.msra.mxu0 %v49_v50 }
  0x36   :  { %336 = vmatpush3.msra.mxu1 %v81_v51  ;;  %302 = vmatprep.subr.mxu0 %v64_v52 }
  0x37   :  { %337 = vmatprep.subr.mxu1 %v96_v53  ;;  %303 = vmatpush3.msra.mxu0 %v48_v54 }
  0x38   :  { %338 = vmatpush3.msra.mxu1 %v80_v55  ;;  %304 = vmatprep.subr.mxu0 %v63_v57 }
  0x39   :  { %339 = vmatprep.subr.mxu1 %v95_v58  ;;  %305 = vmatpush3.msra.mxu0 %v47_v60 }
  0x3a   :  { %340 = vmatpush3.msra.mxu1 %v79_v61  ;;  %306 = vmatprep.subr.mxu0 %v62_v62 }
  0x3b   :  { %341 = vmatprep.subr.mxu1 %v94_v63  ;;  %307 = vmatpush3.msra.mxu0 %v46_v1 }
  0x3c   :  { %180 = vmatprep.mubr.f32.mxu0 %v112_v0  ;;  %342 = vmatpush3.msra.mxu1 %v78_v3 }
  0x3d   :  { %250 = vmatprep.mubr.f32.mxu1 %v113_v2  ;;  %181 = vmatmul.mubr.f32.vlgmr.msra.gmra.mxu0 %v44_v56 }
  0x3e   :  { %251 = vmatmul.mubr.f32.vlgmr.msra.gmra.mxu1 %v45_v59 }
  0xfd   :  { %v308_v5 = vpop.f32.mrf.mxu0 }
  0xfe   :  { %v343_v6 = vpop.f32.mrf.mxu1 }
  0xff   :  { %v309_v7 = vpop.f32.mrf.mxu0 }
 0x100   :  { %v344_v8 = vpop.f32.mrf.mxu1  ;;  %v310_v9 = vadd.f32 %v309_v7, %v308_v5 }
 0x101   :  { %v345_v10 = vadd.f32 %v344_v8, %v343_v6 }
 0x103   :  { %v253_v12 = vadd.f32 %v345_v10, %v310_v9 }
 0x105   :  { %v256_v13 = vadd.f32 %v253_v12, %v43_v11 }
 0x107   :  { %257 = vst [vmem:[#allocation2] sm:$0xf] %v256_v13 }
 0x10e   :  { %v258_v14 = vld [vmem:[#allocation2] sm:$0xf] }
 0x10f   :  { %259 = vst [vmem:[#allocation8] sm:$0xf] %v258_v14 }
 0x110   :  { %405 = shalt.err (!%p402_p0)
}
 0x111   :  { %269 = dma.vmem_to_hbm [thread:$0]  %s267_s1, 64, %s452_s2, [#allocation5]  }
 0x112   :  { %418 = dma.done.wait [#allocation5], 64  }
 0x113   :  { %419 = vsyncadd [#allocation5], 4294967232 }
 0x114   :  { %273 = vsyncpa [#allocation4], 1 }
 0x115   :  { %274 = vsyncpa [#allocation7], 1 }
 0x116   :  { %275 = vsyncpa [#allocation5], 1 }

</bundles_post_ra>
